<compile_context>
chip_gen: v7x
topology: tpu7x:2x2x1
jax: 0.10.0
libtpu: 0.0.40
codegen_flags: <defaults>
</compile_context>

<pallas_src>
import functools

import jax
import jax.numpy as jnp
from jax.experimental import pallas as pl
from jax.experimental.pallas import tpu as pltpu

_LANE = 128
_LANE_CAP = 32768  # max block width in elements; multiple of 128


def _fused_leaky_relu_kernel(bias_ref, x_ref, o_ref, *, negative_slope, scale):
    # bias_ref is either (row_block, 1) or (1, col_block); jnp broadcasting
    # handles both (sublane- or lane-broadcast, cheap on the VPU).
    v = x_ref[...] + bias_ref[...]
    pos = jnp.asarray(scale, dtype=v.dtype)
    neg = jnp.asarray(scale * negative_slope, dtype=v.dtype)
    o_ref[...] = (v * jnp.where(v >= 0, pos, neg)).astype(o_ref.dtype)


@functools.lru_cache(maxsize=None)
def _chip_config():
    """Per-chip block budget / VMEM limit / megacore hint."""
    try:
        vmem_bytes = int(pltpu.get_tpu_info().vmem_capacity_bytes)
    except Exception:
        vmem_bytes = 64 << 20  # conservative (v7x-like) fallback
    if vmem_bytes >= (96 << 20):
        # v5e / v6e: 128 MiB VMEM, 1 TensorCore per chip.
        return {"max_block_bytes": 16 << 20,
                "vmem_limit_bytes": 80 << 20,
                "want_min_two_steps": False}
    # v7x: 64 MiB VMEM per TensorCore, 2 TensorCores per chip.
    return {"max_block_bytes": 8 << 20,
            "vmem_limit_bytes": 48 << 20,
            "want_min_two_steps": True}


def _sublane_multiple(itemsize):
    # f32 -> 8, bf16 -> 16, int8/fp8 -> 32 (packed sublane multiple).
    return 8 * max(1, 4 // int(itemsize))


def _choose_blocks(rows, cols, itemsize, max_block_bytes, want_min_two_steps):
    sub = _sublane_multiple(itemsize)

    # Lane (last) dim: full width when it fits, else a 128-multiple cap.
    col_block = cols if cols <= _LANE_CAP else _LANE_CAP

    # Sublane dim: as many rows as the per-array budget allows, rounded to the
    # dtype's packed sublane multiple (full-dim blocks are always legal).
    rows_budget = max(1, max_block_bytes // max(1, col_block * itemsize))
    rows_budget = max(sub, (rows_budget // sub) * sub)
    row_block = rows if rows <= rows_budget else rows_budget

    # On 2-TensorCore chips, avoid a single-step grid for non-trivial arrays.
    if want_min_two_steps and rows * cols * itemsize > (2 << 20):
        if pl.cdiv(rows, row_block) * pl.cdiv(cols, col_block) < 2:
            half = (rows + 1) // 2
            half_rows = ((half + sub - 1) // sub) * sub
            if sub <= half_rows < rows:
                row_block = half_rows
            elif cols >= 2 * _LANE:
                col_block = max(_LANE, ((cols // 2) // _LANE) * _LANE)
    return row_block, col_block


def fused_leaky_relu(x, bias, negative_slope=0.2, scale=2 ** 0.5,
                     *, max_block_bytes=None):
    """x: (N, C, H, W); bias: (C,). Returns scale * leaky_relu(x + bias bcast)."""
    N, C, H, W = x.shape
    assert bias.shape == (C,)

    cfg = _chip_config()
    if max_block_bytes is None:
        max_block_bytes = cfg["max_block_bytes"]

    hw = H * W
    bias_x = bias.astype(x.dtype)

    if hw >= _LANE and hw % _LANE == 0:
        # Lane-dense already: rows = N*C, per-row bias column.
        rows, cols = N * C, hw
        x2d = x.reshape(rows, cols)
        bias2d = jnp.tile(bias_x, N).reshape(rows, 1)
        bias_is_row = False
    else:
        # Small / ragged H*W: repack to rows = N, cols = C*H*W so the output
        # last dim is large (avoids masked partial stores); bias becomes a
        # precomputed (1, C*H*W) row broadcast over sublanes.
        rows, cols = N, C * hw
        x2d = x.reshape(rows, cols)
        bias2d = jnp.repeat(bias_x, hw).reshape(1, cols)
        bias_is_row = True

    itemsize = int(jnp.dtype(x.dtype).itemsize)
    row_block, col_block = _choose_blocks(
        rows, cols, itemsize, max_block_bytes, cfg["want_min_two_steps"])
    grid = (pl.cdiv(rows, row_block), pl.cdiv(cols, col_block))

    if bias_is_row:
        bias_spec = pl.BlockSpec((1, col_block), lambda i, j: (0, j))
    else:
        bias_spec = pl.BlockSpec((row_block, 1), lambda i, j: (i, 0))

    kernel = functools.partial(
        _fused_leaky_relu_kernel, negative_slope=negative_slope, scale=scale)

    out2d = pl.pallas_call(
        kernel,
        out_shape=jax.ShapeDtypeStruct((rows, cols), x.dtype),
        grid=grid,
        in_specs=[
            bias_spec,
            pl.BlockSpec((row_block, col_block), lambda i, j: (i, j)),
        ],
        out_specs=pl.BlockSpec((row_block, col_block), lambda i, j: (i, j)),
        compiler_params=pltpu.CompilerParams(
            dimension_semantics=("parallel", "parallel"),
            vmem_limit_bytes=cfg["vmem_limit_bytes"],
        ),
    )(bias2d, x2d)

    return out2d.reshape(N, C, H, W)


class FusedLeakyReLU:
    """JAX/Pallas port of the PyTorch FusedLeakyReLU module."""

    def __init__(self, channel, negative_slope=0.2, scale=2 ** 0.5, key=None):
        # PyTorch __init__ uses zeros(channel); a key gives non-zero bias so the
        # bias-broadcast path is actually exercised in the demo.
        if key is None:
            self.bias = jnp.zeros((channel,), dtype=jnp.float32)
        else:
            self.bias = jax.random.normal(key, (channel,), dtype=jnp.float32)
        self.negative_slope = negative_slope
        self.scale = scale

    def __call__(self, x):
        return fused_leaky_relu(x, self.bias, self.negative_slope, self.scale)


def _reference(x, bias, negative_slope=0.2, scale=2 ** 0.5):
    v = x.astype(jnp.float32) + bias.astype(jnp.float32).reshape(
        (1, -1) + (1,) * (x.ndim - 2))
    out = scale * jnp.where(v >= 0, v, v * negative_slope)
    return out.astype(x.dtype)


if __name__ == "__main__":
    key = jax.random.PRNGKey(0)
    kx, kb, kx2, kx3 = jax.random.split(key, 4)

    # Primary demo: (N, C, H, W) = (2, 4, 16, 16), f32 -> (N*C, H*W) layout.
    N, C, H, W = 2, 4, 16, 16
    x = jax.random.normal(kx, (N, C, H, W), dtype=jnp.float32)
    module = FusedLeakyReLU(C, key=kb)
    out = jax.block_until_ready(module(x))
    ref = _reference(x, module.bias, module.negative_slope, module.scale)
    assert out.shape == ref.shape and out.dtype == ref.dtype
    assert jnp.allclose(out, ref, atol=1e-5, rtol=1e-5)

    # bf16 + lane-narrow spatial (7x7): exercises the (N, C*H*W) repack path.
    xb = jax.random.normal(kx2, (2, 4, 7, 7), dtype=jnp.bfloat16)
    outb = jax.block_until_ready(fused_leaky_relu(xb, module.bias))
    refb = _reference(xb, module.bias)
    assert outb.shape == refb.shape and outb.dtype == xb.dtype
    assert jnp.allclose(outb.astype(jnp.float32), refb.astype(jnp.float32),
                        atol=5e-2, rtol=5e-2)

    # Multi-block + ragged rows: tiny block budget forces grid (2, 1) with a
    # ragged 4-row tail (rows = 12, row_block = 8).
    xr = jax.random.normal(kx3, (3, 4, 16, 16), dtype=jnp.float32)
    br = jax.random.normal(kb, (4,), dtype=jnp.float32)
    outr = jax.block_until_ready(
        fused_leaky_relu(xr, br, max_block_bytes=8 << 10))
    refr = _reference(xr, br)
    assert jnp.allclose(outr, refr, atol=1e-5, rtol=1e-5)

    print("KERNEL_OK")
</pallas_src>

<mosaic_0001>
module attributes {stable_mosaic.version = 11 : i64} {
  func.func @_fused_leaky_relu_kernel(%arg0: i32, %arg1: i32, %arg2: memref<8x1xf32, #tpu.memory_space<vmem>>, %arg3: memref<8x256xf32, #tpu.memory_space<vmem>>, %arg4: memref<8x256xf32, #tpu.memory_space<vmem>>) attributes {dimension_semantics = [#tpu.dimension_semantics<parallel>, #tpu.dimension_semantics<parallel>], iteration_bounds = array<i64: 1, 1>, scalar_prefetch = 0 : i64, scratch_operands = 0 : i64, tpu.core_type = #tpu.core_type<tc>, window_params = [{transform_indices = @transform_0, window_bounds = array<i64: 8, 1>}, {transform_indices = @transform_1, window_bounds = array<i64: 8, 256>}, {transform_indices = @transform_2, window_bounds = array<i64: 8, 256>}]} {
    %c0 = arith.constant 0 : index
    %c0_0 = arith.constant 0 : index
    %0 = vector.load %arg3[%c0, %c0_0] : memref<8x256xf32, #tpu.memory_space<vmem>>, vector<8x256xf32>
    %c0_1 = arith.constant 0 : index
    %c0_2 = arith.constant 0 : index
    %1 = vector.load %arg2[%c0_1, %c0_2] : memref<8x1xf32, #tpu.memory_space<vmem>>, vector<8x1xf32>
    %2 = vector.broadcast %1 : vector<8x1xf32> to vector<8x256xf32>
    %3 = arith.addf %0, %2 : vector<8x256xf32>
    %cst = arith.constant 0.000000e+00 : f32
    %4 = vector.broadcast %cst : f32 to vector<8x256xf32>
    %5 = arith.cmpf oge, %3, %4 : vector<8x256xf32>
    %cst_3 = arith.constant 1.41421354 : f32
    %cst_4 = arith.constant 0.282842726 : f32
    %6 = vector.broadcast %cst_3 : f32 to vector<8x256xf32>
    %7 = vector.broadcast %cst_4 : f32 to vector<8x256xf32>
    %8 = arith.select %5, %6, %7 : vector<8x256xi1>, vector<8x256xf32>
    %9 = arith.mulf %3, %8 : vector<8x256xf32>
    %c0_5 = arith.constant 0 : index
    %c0_6 = arith.constant 0 : index
    %10 = vector.load %arg4[%c0_5, %c0_6] : memref<8x256xf32, #tpu.memory_space<vmem>>, vector<8x256xf32>
    tpu.vector_store %arg4[%c0_5, %c0_6], %9 {strides = array<i32>} : memref<8x256xf32, #tpu.memory_space<vmem>>, vector<8x256xf32>,
    return
  }
  func.func @transform_0(%arg0: i32, %arg1: i32) -> (i32, i32) {
    %c0_i32 = arith.constant 0 : i32
    %c0_i32_0 = arith.constant 0 : i32
    return %arg0, %c0_i32 : i32, i32
  }
  func.func @transform_1(%arg0: i32, %arg1: i32) -> (i32, i32) {
    %c0_i32 = arith.constant 0 : i32
    return %arg0, %arg1 : i32, i32
  }
  func.func @transform_2(%arg0: i32, %arg1: i32) -> (i32, i32) {
    %c0_i32 = arith.constant 0 : i32
    return %arg0, %arg1 : i32, i32
  }
}

</mosaic_0001>

<bundles_post_ra>
// kernel: tpu_custom_call.1
= control target key start
LH: loop header
LB: loop body
LE: loop exit
PB: predicated region body
PF: predicated region fallthrough
CT: control target
= control target key end

     0   :  { %7 = vsyncpa [#allocation3], 0  ;;  %s156_s0 = inlined_call_operand.vmem [shape: f32[8,1], index: 0, kind: input, shape index: {}]   ;;  %s157_s1 = inlined_call_operand.hbm [shape: f32[8,256], index: 1, kind: input, shape index: {}]   ;;  %s158_s2 = inlined_call_operand.hbm [shape: f32[8,256], index: 2, kind: output, shape index: {}]  }
   0x1   :  { %8 = vsyncpa [#allocation4], 0  ;;  %s110_s9 = smov [#allocation2]   ;;  %s62_s13 = scalar_lea.hbm %s157_s1, 256 }
   0x2   :  { %s17_s10 = sshll.u32 %s110_s9, 4  ;;  %p63_p0 = scmp.ne.s32.totalorder %s157_s1, %s62_s13  ;;  %s18_s10 = int_to_ptr.vmem [resolvable:$true] %s17_s10 }
   0x3   :  { %p66_p1 = scmp.lt.u32.totalorder %s62_s13, %s157_s1 }
   0x5   :  { %p68_p2 = pnand %p66_p1, %p63_p0 }
   0x7   :  { %71 = shalt.err (!%p68_p2)
}
   0x8   :  { %s72_s18 = scalar_lea.vmem %s18_s10, 256  ;;  %p77_p4 = scmp.lt.s32.totalorder %s18_s10, %s18_s10 }
   0x9   :  { %p73_p3 = scmp.ne.s32.totalorder %s18_s10, %s72_s18  ;;  %p78_p5 = scmp.lt.s32.totalorder %s72_s18, %s72_s18 }
   0xb   :  { %p79_p6 = por %p78_p5, %p77_p4 }
   0xd   :  { %p80_p7 = pnand %p79_p6, %p73_p3 }
   0xf   :  { %83 = shalt.err (!%p80_p7)
}
  0x10   :  { %20 = dma.hbm_to_vmem [thread:$0]  %s157_s1, 256, %s18_s10, [#allocation3]  }
  0x11   :  { %106 = dma.done.wait [#allocation3], 256  }
  0x12   :  { %107 = vsyncadd [#allocation3], 4294967040  ;;  %v111_v0 = vmov 0   ;;  %v26_v1 = vld [vmem:[%s156_s0] sm:$0xff]  ;;  %v25_v3 = vld [vmem:[#allocation2 + $0x8] sm:$0xff]  ;;  %s112_s23 = smov [#allocation5]  }
  0x13   :  { %61 = vset.pattern.permute.xlu0 %v111_v0  ;;  %v24_v2 = vld [vmem:[#allocation2] sm:$0xff]  ;;  %s48_s24 = sshll.u32 %s112_s23, 4  ;;  %v113_v7 = vmov 0.28284273   ;;  %s49_s24 = int_to_ptr.vmem [resolvable:$true] %s48_s24 }
  0x14   :  { %29 = vperm.xlu0 %61, %v26_v1   ;;  %s84_s1 = scalar_lea.vmem %s49_s24, 256  ;;  %p89_p9 = scmp.lt.s32.totalorder %s49_s24, %s49_s24 }
  0x15   :  { %p85_p8 = scmp.ne.s32.totalorder %s49_s24, %s84_s1  ;;  %p90_p10 = scmp.lt.s32.totalorder %s84_s1, %s84_s1 }
  0x17   :  { %p91_p11 = por %p90_p10, %p89_p9 }
  0x19   :  { %p92_p12 = pnand %p91_p11, %p85_p8 }
  0x93   :  { %v30_v4 = vpop.permute.xlu0 %29 }
  0x94   :  { %v32_v5 = vadd.f32 %v30_v4, %v24_v2  ;;  %v33_v6 = vadd.f32 %v30_v4, %v25_v3 }
  0x96   :  { %vm34_vm0 = vcmp.ge.f32.partialorder %v32_v5, 0.0  ;;  %vm35_vm1 = vcmp.ge.f32.partialorder %v33_v6, 0.0 }
  0x97   :  { %v36_v8 = vsel %vm34_vm0, 1.4142135, %v113_v7  ;;  %v37_v9 = vsel %vm35_vm1, 1.4142135, %v113_v7 }
  0x98   :  { %v38_v10 = vmul.f32 %v36_v8, %v32_v5  ;;  %v39_v11 = vmul.f32 %v37_v9, %v33_v6 }
  0x9a   :  { %40 = vst [vmem:[#allocation5] sm:$0xff] %v38_v10  ;;  %41 = vst [vmem:[#allocation5 + $0x8] sm:$0xff] %v39_v11 }
  0x9b   :  { %95 = shalt.err (!%p92_p12)
}
  0x9c   :  { %s96_s26 = scalar_lea.hbm %s158_s2, 256 }
  0x9d   :  { %p97_p13 = scmp.ne.s32.totalorder %s158_s2, %s96_s26  ;;  %p100_p0 = scmp.lt.u32.totalorder %s96_s26, %s158_s2 }
  0x9f   :  { %p102_p1 = pnand %p100_p0, %p97_p13 }
  0xa1   :  { %105 = shalt.err (!%p102_p1)
}
  0xa2   :  { %51 = dma.vmem_to_hbm [thread:$0]  %s49_s24, 256, %s158_s2, [#allocation4]  }
  0xa3   :  { %108 = dma.done.wait [#allocation4], 256  }
  0xa4   :  { %109 = vsyncadd [#allocation4], 4294967040 }
  0xa5   :  { %55 = vsyncpa [#allocation3], 1 }
  0xa6   :  { %56 = vsyncpa [#allocation4], 1 }

</bundles_post_ra>
